<compile_context>
chip_gen: v5e
topology: v5e:2x2
jax: 0.10.0
libtpu: 0.0.40
codegen_flags: <defaults>
</compile_context>

<pallas_src>
import functools

import jax
import jax.numpy as jnp
from jax.experimental import pallas as pl
from jax.experimental.pallas import tpu as pltpu


def _round_up(x, m):
    return ((x + m - 1) // m) * m


def _patch_embed_kernel(x_ref, w_ref, b_ref, o_ref):
    # x_ref: (TM, K) patch strip; w_ref: (K, E_pad) resident weight;
    # b_ref: (1, E_pad) f32 bias; o_ref: (TM, E_pad).
    acc = jnp.dot(x_ref[...], w_ref[...], preferred_element_type=jnp.float32)
    o_ref[...] = (acc + b_ref[...].astype(jnp.float32)).astype(o_ref.dtype)


def _pick_tile_m(m, k, e_pad, in_bytes, out_bytes, sublane):
    """Largest TM (multiple of `sublane`, <=1024) fitting a conservative VMEM
    budget: resident weight/bias + double-buffered LHS strip + double-buffered
    output strip."""
    budget = 12 * 1024 * 1024  # fits v5e's 16 MiB scoped default w/ headroom
    fixed = (k * e_pad + e_pad) * in_bytes
    per_row = 2 * k * in_bytes + 2 * e_pad * out_bytes
    tm = max(budget - fixed, per_row) // per_row
    tm = max(sublane, (tm // sublane) * sublane)
    tm = min(tm, 1024)                      # amortizes ~0.35 us/step overhead
    tm = min(tm, _round_up(m, sublane))     # don't over-tile small problems
    return int(tm)


@functools.partial(jax.jit, static_argnames=("patch_size", "compute_dtype"))
def patch_embed_2d(x, weight, bias, *, patch_size, compute_dtype=None):
    """x: (B, C, H, W) NCHW. weight: (E, C, P, P) (PyTorch Conv2d layout).
    bias: (E,). Returns (B, Np, E)."""
    B, C, H, W = x.shape
    P = patch_size
    E = weight.shape[0]
    assert weight.shape[1] == C
    assert H % P == 0 and W % P == 0, "H and W must be divisible by patch_size"
    Hp, Wp = H // P, W // P
    Np = Hp * Wp
    K = C * P * P
    M = B * Np

    out_dtype = x.dtype
    cdt = jnp.dtype(compute_dtype) if compute_dtype is not None else jnp.dtype(x.dtype)

    # --- layout glue (fused under jit): im2col for non-overlapping patches ---
    # (B, C, Hp, P, Wp, P) -> (B, Hp, Wp, C, P, P) -> (B*Np, C*P*P)
    patches = x.reshape(B, C, Hp, P, Wp, P)
    patches = patches.transpose(0, 2, 4, 1, 3, 5).reshape(M, K)
    # Conv2d weight (E, C, P, P) -> (K, E) with matching (C, kh, kw) order.
    w_mat = weight.reshape(E, K).T
    b_mat = bias.reshape(1, E).astype(jnp.float32)

    patches = patches.astype(cdt)
    w_mat = w_mat.astype(cdt)

    # --- lane/sublane padding and tile selection ---
    E_pad = _round_up(E, 128)               # lane-dense output stores
    sublane = 16 if cdt == jnp.dtype(jnp.bfloat16) else 8
    in_bytes = cdt.itemsize
    out_bytes = jnp.dtype(out_dtype).itemsize
    TM = _pick_tile_m(M, K, E_pad, in_bytes, out_bytes, sublane)
    M_pad = _round_up(M, TM)

    if M_pad != M:
        patches = jnp.pad(patches, ((0, M_pad - M), (0, 0)))
    if E_pad != E:
        w_mat = jnp.pad(w_mat, ((0, 0), (0, E_pad - E)))
        b_mat = jnp.pad(b_mat, ((0, 0), (0, E_pad - E)))

    grid = (M_pad // TM,)
    cost = pl.CostEstimate(
        flops=2 * M_pad * K * E_pad,
        transcendentals=0,
        bytes_accessed=(M_pad * K + K * E_pad) * in_bytes
        + M_pad * E_pad * out_bytes,
    )

    out = pl.pallas_call(
        _patch_embed_kernel,
        out_shape=jax.ShapeDtypeStruct((M_pad, E_pad), out_dtype),
        grid_spec=pltpu.PrefetchScalarGridSpec(
            num_scalar_prefetch=0,
            grid=grid,
            in_specs=[
                pl.BlockSpec((TM, K), lambda i: (i, 0)),       # LHS strip
                pl.BlockSpec((K, E_pad), lambda i: (0, 0)),    # resident weight
                pl.BlockSpec((1, E_pad), lambda i: (0, 0)),    # resident bias
            ],
            out_specs=pl.BlockSpec((TM, E_pad), lambda i: (i, 0)),
        ),
        compiler_params=pltpu.CompilerParams(
            dimension_semantics=("parallel",),  # shards M across TCs on v7x
        ),
        cost_estimate=cost,
    )(patches, w_mat, b_mat)

    return out[:M, :E].reshape(B, Np, E)


if __name__ == "__main__":
    # Small deterministic example consistent with the module:
    # batch=2, in_channels=4, spatial=16x16, patch_size=4, emb_dim=32.
    B, C, H, W = 2, 4, 16, 16
    P = 4
    E = 32

    key = jax.random.PRNGKey(0)
    kx, kw, kb = jax.random.split(key, 3)

    x = jax.random.normal(kx, (B, C, H, W), dtype=jnp.float32)
    fan_in = C * P * P
    bound = 1.0 / (fan_in ** 0.5)
    weight = jax.random.uniform(kw, (E, C, P, P), jnp.float32, -bound, bound)
    bias = jax.random.uniform(kb, (E,), jnp.float32, -bound, bound)

    # f32 path (exact-ish vs the XLA conv reference).
    out = patch_embed_2d(x, weight, bias, patch_size=P)
    out = jax.block_until_ready(out)

    ref = jax.lax.conv_general_dilated(
        x, weight, window_strides=(P, P), padding="VALID",
        dimension_numbers=("NCHW", "OIHW", "NCHW"),
    ) + bias.reshape(1, E, 1, 1)
    ref = ref.reshape(B, E, -1).transpose(0, 2, 1)
    assert out.shape == (B, (H // P) * (W // P), E)
    assert jnp.allclose(out, ref, atol=1e-4, rtol=1e-4)

    # bf16 compute path (recommended on v6e/v7x): bf16 MXU inputs, f32 accum.
    out_bf16 = patch_embed_2d(x, weight, bias, patch_size=P,
                              compute_dtype=jnp.bfloat16)
    out_bf16 = jax.block_until_ready(out_bf16)
    assert jnp.allclose(out_bf16, ref, atol=5e-2, rtol=5e-2)

    print("KERNEL_OK")
</pallas_src>

<mosaic_0001>
module attributes {stable_mosaic.version = 11 : i64} {
  func.func @_patch_embed_kernel(%arg0: i32, %arg1: memref<32x64xf32, #tpu.memory_space<vmem>>, %arg2: memref<64x128xf32, #tpu.memory_space<vmem>>, %arg3: memref<1x128xf32, #tpu.memory_space<vmem>>, %arg4: memref<32x128xf32, #tpu.memory_space<vmem>>) attributes {dimension_semantics = [#tpu.dimension_semantics<parallel>], iteration_bounds = array<i64: 1>, scalar_prefetch = 0 : i64, scratch_operands = 0 : i64, tpu.core_type = #tpu.core_type<tc>, window_params = [{transform_indices = @transform_0, window_bounds = array<i64: 32, 64>}, {pipeline_mode = #tpu.pipeline_mode<synchronous>, transform_indices = @transform_1, window_bounds = array<i64: 64, 128>}, {pipeline_mode = #tpu.pipeline_mode<synchronous>, transform_indices = @transform_2, window_bounds = array<i64: 1, 128>}, {transform_indices = @transform_3, window_bounds = array<i64: 32, 128>}]} {
    %c0 = arith.constant 0 : index
    %c0_0 = arith.constant 0 : index
    %0 = vector.load %arg1[%c0, %c0_0] : memref<32x64xf32, #tpu.memory_space<vmem>>, vector<32x64xf32>
    %c0_1 = arith.constant 0 : index
    %c0_2 = arith.constant 0 : index
    %1 = vector.load %arg2[%c0_1, %c0_2] : memref<64x128xf32, #tpu.memory_space<vmem>>, vector<64x128xf32>
    %cst = arith.constant dense<0.000000e+00> : vector<32x128xf32>
    %2 = tpu.matmul %0, %1, %cst {dimension_numbers = #tpu.dot_dimension_numbers<[1], [0], [0], [1], [0, 0, 1, 1], [], []>} : vector<32x64xf32>, vector<64x128xf32>, vector<32x128xf32> -> vector<32x128xf32>
    %c0_3 = arith.constant 0 : index
    %c0_4 = arith.constant 0 : index
    %3 = vector.load %arg3[%c0_3, %c0_4] : memref<1x128xf32, #tpu.memory_space<vmem>>, vector<1x128xf32>
    %4 = vector.broadcast %3 : vector<1x128xf32> to vector<32x128xf32>
    %5 = arith.addf %2, %4 : vector<32x128xf32>
    %c0_5 = arith.constant 0 : index
    %c0_6 = arith.constant 0 : index
    %6 = vector.load %arg4[%c0_5, %c0_6] : memref<32x128xf32, #tpu.memory_space<vmem>>, vector<32x128xf32>
    tpu.vector_store %arg4[%c0_5, %c0_6], %5 {strides = array<i32>} : memref<32x128xf32, #tpu.memory_space<vmem>>, vector<32x128xf32>,
    return
  }
  func.func @transform_0(%arg0: i32) -> (i32, i32) {
    %c0_i32 = arith.constant 0 : i32
    %c0_i32_0 = arith.constant 0 : i32
    return %arg0, %c0_i32 : i32, i32
  }
  func.func @transform_1(%arg0: i32) -> (i32, i32) {
    %c0_i32 = arith.constant 0 : i32
    %c0_i32_0 = arith.constant 0 : i32
    %c0_i32_1 = arith.constant 0 : i32
    return %c0_i32, %c0_i32_0 : i32, i32
  }
  func.func @transform_2(%arg0: i32) -> (i32, i32) {
    %c0_i32 = arith.constant 0 : i32
    %c0_i32_0 = arith.constant 0 : i32
    %c0_i32_1 = arith.constant 0 : i32
    return %c0_i32, %c0_i32_0 : i32, i32
  }
  func.func @transform_3(%arg0: i32) -> (i32, i32) {
    %c0_i32 = arith.constant 0 : i32
    %c0_i32_0 = arith.constant 0 : i32
    return %arg0, %c0_i32 : i32, i32
  }
}

</mosaic_0001>

<bundles_post_ra>
// kernel: patch_embed_2d.1
= control target key start
LH: loop header
LB: loop body
LE: loop exit
PB: predicated region body
PF: predicated region fallthrough
CT: control target
= control target key end

     0   :  { %s218_s0 = inlined_call_operand.vmem [shape: f32[32,64], index: 0, kind: input, shape index: {}]   ;;  %s219_s1 = inlined_call_operand.vmem [shape: f32[64,128], index: 1, kind: input, shape index: {}]   ;;  %s220_s2 = inlined_call_operand.vmem [shape: f32[1,128], index: 2, kind: input, shape index: {}]   ;;  %s221_s3 = inlined_call_operand.hbm [shape: f32[32,128], index: 3, kind: output, shape index: {}]  }
   0x1   :  { %v26_v0 = vld [vmem:[%s219_s1 + $0x38] sm:$0xff]  ;;  %v25_v1 = vld [vmem:[%s219_s1 + $0x30] sm:$0xff]  ;;  %v24_v2 = vld [vmem:[%s219_s1 + $0x28] sm:$0xff] }
   0x2   :  { %100 = vmatpush.msra.mxu2 %v26_v0  ;;  %101 = vmatpush.msra.mxu3 %v26_v0  ;;  %v23_v3 = vld [vmem:[%s219_s1 + $0x20] sm:$0xff] }
   0x3   :  { %52 = vmatpush.msra.mxu0 %v26_v0  ;;  %99 = vmatpush.msra.mxu1 %v26_v0 }
   0x4   :  { %103 = vmatpush.msra.mxu2 %v25_v1  ;;  %104 = vmatpush.msra.mxu3 %v25_v1 }
   0x5   :  { %53 = vmatpush.msra.mxu0 %v25_v1  ;;  %102 = vmatpush.msra.mxu1 %v25_v1 }
   0x6   :  { %8 = vsyncpa [#allocation3], 0  ;;  %106 = vmatpush.msra.mxu2 %v24_v2  ;;  %107 = vmatpush.msra.mxu3 %v24_v2  ;;  %v22_v4 = vld [vmem:[%s219_s1 + $0x18] sm:$0xff]  ;;  %v21_v5 = vld [vmem:[%s219_s1 + $0x10] sm:$0xff]  ;;  %vm31_vm0 = vcmask 523264   ;;  %s153_s10 = smov [#allocation2]  }
   0x7   :  { %54 = vmatpush.msra.mxu0 %v24_v2  ;;  %105 = vmatpush.msra.mxu1 %v24_v2  ;;  %v20_v6 = vld [vmem:[%s219_s1 + $0x8] sm:$0xff]  ;;  %v19_v7 = vld [vmem:[%s219_s1] sm:$0xff]  ;;  %v17_v8 = vld [vmem:[%s218_s0 + $0x10] sm:$0xff]  ;;  %s81_s11 = sshll.u32 %s153_s10, 4  ;;  %s155_s14 = smov 8   ;;  %s82_s11 = int_to_ptr.vmem [resolvable:$true] %s81_s11 }
   0x8   :  { %109 = vmatpush.msra.mxu2 %v23_v3  ;;  %110 = vmatpush.msra.mxu3 %v23_v3  ;;  %v18_v9 = vld [vmem:[%s218_s0 + $0x18] sm:$0xff]  ;;  %v15_v10 = vld [vmem:[%s218_s0] sm:$0xff]  ;;  %v16_v11 = vld [vmem:[%s218_s0 + $0x8] sm:$0xff]  ;;  %s83_s0 = sshll.u32 %s221_s3, 4  ;;  %s84_s0 = int_to_ptr.hbm [resolvable:$true] %s83_s0 }
   0x9   :  { %55 = vmatpush.msra.mxu0 %v23_v3  ;;  %108 = vmatpush.msra.mxu1 %v23_v3  ;;  %v126_v12 = vld [vmem:[%s220_s2] ss:$0 sm:$0xff]  ;;  %s154_s2 = smov 128  }
   0xa   :  { %112 = vmatpush.msra.mxu2 %v22_v4  ;;  %113 = vmatpush.msra.mxu3 %v22_v4 }
   0xb   :  { %56 = vmatpush.msra.mxu0 %v22_v4  ;;  %111 = vmatpush.msra.mxu1 %v22_v4 }
   0xc   :  { %115 = vmatpush.msra.mxu2 %v21_v5  ;;  %116 = vmatpush.msra.mxu3 %v21_v5 }
   0xd   :  { %57 = vmatpush.msra.mxu0 %v21_v5  ;;  %114 = vmatpush.msra.mxu1 %v21_v5 }
   0xe   :  { %118 = vmatpush.msra.mxu2 %v20_v6  ;;  %119 = vmatpush.msra.mxu3 %v20_v6 }
   0xf   :  { %58 = vmatpush.msra.mxu0 %v20_v6  ;;  %117 = vmatpush.msra.mxu1 %v20_v6 }
  0x10   :  { %121 = vmatpush.msra.mxu2 %v19_v7  ;;  %122 = vmatpush.msra.mxu3 %v19_v7 }
  0x11   :  { %97 = vmatmul.msk.f32.vlgmr.msra.gmra.mxu2 %vm31_vm0, %v17_v8  ;;  %98 = vmatmul.msk.f32.vlgmr.msra.gmra.mxu3 %vm31_vm0, %v18_v9 }
  0x12   :  { %59 = vmatpush.msra.mxu0 %v19_v7  ;;  %120 = vmatpush.msra.mxu1 %v19_v7 }
  0x13   :  { %95 = vmatmul.msk.f32.vlgmr.msra.gmra.mxu0 %vm31_vm0, %v15_v10  ;;  %96 = vmatmul.msk.f32.vlgmr.msra.gmra.mxu1 %vm31_vm0, %v16_v11 }
  0x90   :  { %v61_v13 = vpop.f32.mrf.mxu0  ;;  %v64_v14 = vpop.f32.mrf.mxu1 }
  0x91   :  { %v62_v15 = vadd.f32 %v126_v12, %v61_v13  ;;  %v65_v16 = vadd.f32 %v126_v12, %v64_v14 }
  0x93   :  { %73 = vst [vmem:[#allocation2] sm:$0xff] %v62_v15 }
  0x94   :  { %74 = vst [vmem:[#allocation2 + $0x8] sm:$0xff] %v65_v16  ;;  %v67_v17 = vpop.f32.mrf.mxu2  ;;  %v70_v18 = vpop.f32.mrf.mxu3 }
  0x95   :  { %v68_v19 = vadd.f32 %v126_v12, %v67_v17  ;;  %v71_v20 = vadd.f32 %v126_v12, %v70_v18 }
  0x97   :  { %75 = vst [vmem:[#allocation2 + $0x10] sm:$0xff] %v68_v19 }
  0x98   :  { %76 = vst [vmem:[#allocation2 + $0x18] sm:$0xff] %v71_v20 }
  0x99   :  { %89 = dma.vmem_to_hbm [thread:$0]  %s82_s11, 512, %s84_s0, [#allocation3], %s154_s2, %s154_s2, %s155_s14  }
  0x9a   :  { %151 = dma.done.wait [#allocation3], 512  }
  0x9b   :  { %152 = vsyncadd [#allocation3], 4294966784 }
  0x9c   :  { %94 = vsyncpa [#allocation3], 1 }

</bundles_post_ra>
